<compile_context>
chip_gen: v5e
topology: v5e:2x2
jax: 0.10.0
libtpu: 0.0.40
codegen_flags: <defaults>
</compile_context>

<pallas_src>
import functools

import jax
import jax.numpy as jnp
from jax.experimental import pallas as pl
from jax.experimental.pallas import tpu as pltpu

LANES = 128
MAX_TILE_ROWS = 4096            # f32: 2 MiB/block; 6 live blocks = 12 MiB (< 16 MiB v5e scoped)
DEFAULT_MIN_PALLAS_ELEMS = 1 << 17   # below this, fused jnp beats kernel launch overhead


def _compute_dtype(dtype):
    dtype = jnp.dtype(dtype)
    if dtype in (jnp.dtype(jnp.float32), jnp.dtype(jnp.bfloat16)):
        return dtype
    if jnp.issubdtype(dtype, jnp.integer):
        return dtype                      # native integer math: exact x**2 - 3x
    return jnp.dtype(jnp.float32)         # fp16 / fp8 / etc. -> f32 math


# ---------------------------------------------------------------------------
# Fused pure-jnp expressions (small-input bypass and <128-elem tail handling).
# Python literals are weakly typed, so the math stays in `compute_dtype`.
# ---------------------------------------------------------------------------
def _fused_val(x, compute_dtype):
    xc = x.astype(compute_dtype)
    return (xc * (xc - 3)).astype(x.dtype)


def _fused_grad(x, compute_dtype):
    xc = x.astype(compute_dtype)
    t = xc - 3
    return (xc * t).astype(x.dtype), (xc + t).astype(x.dtype)


# ---------------------------------------------------------------------------
# Pallas kernels: load in original dtype, cast in-kernel, cast back on store.
# ---------------------------------------------------------------------------
def _sub_grad_kernel(x_ref, y_ref, dy_ref, *, compute_dtype):
    """y = x*(x-3) = x**2 - 3x ; dy = x + (x-3) = 2x - 3."""
    x = x_ref[...].astype(compute_dtype)
    t = x - 3
    y_ref[...] = (x * t).astype(y_ref.dtype)
    dy_ref[...] = (x + t).astype(dy_ref.dtype)


def _sub_val_kernel(x_ref, y_ref, *, compute_dtype):
    """grad=False path: value only (no dead dy HBM traffic)."""
    x = x_ref[...].astype(compute_dtype)
    y_ref[...] = (x * (x - 3)).astype(y_ref.dtype)


def sub_forward(x, grad=True, *, min_pallas_elems=DEFAULT_MIN_PALLAS_ELEMS):
    """Pallas implementation of Sub(Pow(I(),2), Times(I(),3.0)).forward."""
    orig_shape = x.shape
    orig_dtype = x.dtype
    cd = _compute_dtype(orig_dtype)
    n = x.size

    # --- small-input bypass: overhead-dominated, let XLA fuse it ---
    if n < max(min_pallas_elems, LANES):
        if grad:
            return _fused_grad(x, cd)
        return _fused_val(x, cd)

    x_flat = x.reshape(-1)
    n_bulk = (n // LANES) * LANES          # lane-aligned bulk handled by Pallas
    rows = n_bulk // LANES
    x2d = x_flat[:n_bulk].reshape(rows, LANES)

    itemsize = jnp.dtype(orig_dtype).itemsize
    sub = max(8, 32 // itemsize)           # sublane-tile multiple for this dtype

    # Aim for >= 2 blocks (v7x: both TensorCores stream) capped at MAX_TILE_ROWS.
    half = sub * pl.cdiv(pl.cdiv(rows, 2), sub)
    tile_rows = max(sub, min(MAX_TILE_ROWS, half))
    grid = (pl.cdiv(rows, tile_rows),)

    spec = pl.BlockSpec((tile_rows, LANES), lambda i: (i, 0))
    n_out = 2 if grad else 1
    cost = pl.CostEstimate(
        flops=(3 if grad else 2) * n_bulk,
        transcendentals=0,
        bytes_accessed=(1 + n_out) * n_bulk * itemsize,
    )
    cparams = pltpu.CompilerParams(dimension_semantics=("parallel",))

    if grad:
        kern = functools.partial(_sub_grad_kernel, compute_dtype=cd)
        y2d, dy2d = pl.pallas_call(
            kern,
            out_shape=(
                jax.ShapeDtypeStruct((rows, LANES), orig_dtype),
                jax.ShapeDtypeStruct((rows, LANES), orig_dtype),
            ),
            grid=grid,
            in_specs=[spec],
            out_specs=(spec, spec),
            compiler_params=cparams,
            cost_estimate=cost,
        )(x2d)
        if n_bulk == n:
            return y2d.reshape(orig_shape), dy2d.reshape(orig_shape)
        ty, tdy = _fused_grad(x_flat[n_bulk:], cd)
        y = jnp.concatenate([y2d.reshape(-1), ty]).reshape(orig_shape)
        dy = jnp.concatenate([dy2d.reshape(-1), tdy]).reshape(orig_shape)
        return y, dy
    else:
        kern = functools.partial(_sub_val_kernel, compute_dtype=cd)
        y2d = pl.pallas_call(
            kern,
            out_shape=jax.ShapeDtypeStruct((rows, LANES), orig_dtype),
            grid=grid,
            in_specs=[spec],
            out_specs=spec,
            compiler_params=cparams,
            cost_estimate=cost,
        )(x2d)
        if n_bulk == n:
            return y2d.reshape(orig_shape)
        ty = _fused_val(x_flat[n_bulk:], cd)
        return jnp.concatenate([y2d.reshape(-1), ty]).reshape(orig_shape)


if __name__ == "__main__":
    key = jax.random.PRNGKey(0)
    # NCHW input, matching a typical torch tensor fed through Func trees.
    x = jax.random.normal(key, (2, 4, 16, 16), dtype=jnp.float32)
    y_ref = x ** 2 - 3.0 * x
    dy_ref = 2.0 * x - 3.0

    # 1) default path on the small shape (takes the fused-jnp bypass).
    y, dy = sub_forward(x, grad=True)
    jax.block_until_ready((y, dy))
    assert jnp.allclose(y, y_ref, atol=1e-5, rtol=1e-5)
    assert jnp.allclose(dy, dy_ref, atol=1e-5, rtol=1e-5)

    # 2) same shape, forced through the Pallas kernel (grid of 2 blocks).
    y_p, dy_p = sub_forward(x, grad=True, min_pallas_elems=0)
    jax.block_until_ready((y_p, dy_p))
    assert jnp.allclose(y_p, y_ref, atol=1e-5, rtol=1e-5)
    assert jnp.allclose(dy_p, dy_ref, atol=1e-5, rtol=1e-5)

    # 3) streaming-scale input: natural Pallas path, grad and value-only kernels.
    xl = jax.random.normal(jax.random.PRNGKey(2), (8, 8, 64, 64), dtype=jnp.float32)
    yl, dyl = sub_forward(xl, grad=True)
    jax.block_until_ready((yl, dyl))
    assert jnp.allclose(yl, xl * (xl - 3.0), atol=1e-5, rtol=1e-5)
    assert jnp.allclose(dyl, 2.0 * xl - 3.0, atol=1e-5, rtol=1e-5)
    yl_only = sub_forward(xl, grad=False)
    jax.block_until_ready(yl_only)
    assert jnp.allclose(yl_only, xl * (xl - 3.0), atol=1e-5, rtol=1e-5)

    # 4) bf16-native, lane-ragged input (Pallas on the aligned bulk + jnp tail).
    xb = jax.random.normal(jax.random.PRNGKey(1), (6, 9, 100), dtype=jnp.bfloat16)
    yb, dyb = sub_forward(xb, grad=True, min_pallas_elems=0)
    jax.block_until_ready((yb, dyb))
    xb32 = xb.astype(jnp.float32)
    assert jnp.allclose(yb.astype(jnp.float32), xb32 * (xb32 - 3.0),
                        atol=3e-2, rtol=3e-2)
    assert jnp.allclose(dyb.astype(jnp.float32), 2.0 * xb32 - 3.0,
                        atol=3e-2, rtol=3e-2)

    print("KERNEL_OK")
</pallas_src>

<mosaic_0001>
module attributes {stable_mosaic.version = 11 : i64} {
  func.func @_sub_grad_kernel(%arg0: i32, %arg1: memref<8x128xf32, #tpu.memory_space<vmem>>, %arg2: memref<8x128xf32, #tpu.memory_space<vmem>>, %arg3: memref<8x128xf32, #tpu.memory_space<vmem>>) attributes {dimension_semantics = [#tpu.dimension_semantics<parallel>], iteration_bounds = array<i64: 2>, scalar_prefetch = 0 : i64, scratch_operands = 0 : i64, tpu.core_type = #tpu.core_type<tc>, window_params = [{transform_indices = @transform_0, window_bounds = array<i64: 8, 128>}, {transform_indices = @transform_1, window_bounds = array<i64: 8, 128>}, {transform_indices = @transform_2, window_bounds = array<i64: 8, 128>}]} {
    %c0 = arith.constant 0 : index
    %c0_0 = arith.constant 0 : index
    %0 = vector.load %arg1[%c0, %c0_0] : memref<8x128xf32, #tpu.memory_space<vmem>>, vector<8x128xf32>
    %cst = arith.constant 3.000000e+00 : f32
    %1 = vector.broadcast %cst : f32 to vector<8x128xf32>
    %2 = arith.subf %0, %1 : vector<8x128xf32>
    %3 = arith.mulf %0, %2 : vector<8x128xf32>
    %c0_1 = arith.constant 0 : index
    %c0_2 = arith.constant 0 : index
    %4 = vector.load %arg2[%c0_1, %c0_2] : memref<8x128xf32, #tpu.memory_space<vmem>>, vector<8x128xf32>
    tpu.vector_store %arg2[%c0_1, %c0_2], %3 {strides = array<i32>} : memref<8x128xf32, #tpu.memory_space<vmem>>, vector<8x128xf32>,
    %5 = arith.addf %0, %2 : vector<8x128xf32>
    %c0_3 = arith.constant 0 : index
    %c0_4 = arith.constant 0 : index
    %6 = vector.load %arg3[%c0_3, %c0_4] : memref<8x128xf32, #tpu.memory_space<vmem>>, vector<8x128xf32>
    tpu.vector_store %arg3[%c0_3, %c0_4], %5 {strides = array<i32>} : memref<8x128xf32, #tpu.memory_space<vmem>>, vector<8x128xf32>,
    return
  }
  func.func @transform_0(%arg0: i32) -> (i32, i32) {
    %c0_i32 = arith.constant 0 : i32
    %c0_i32_0 = arith.constant 0 : i32
    return %arg0, %c0_i32 : i32, i32
  }
  func.func @transform_1(%arg0: i32) -> (i32, i32) {
    %c0_i32 = arith.constant 0 : i32
    %c0_i32_0 = arith.constant 0 : i32
    return %arg0, %c0_i32 : i32, i32
  }
  func.func @transform_2(%arg0: i32) -> (i32, i32) {
    %c0_i32 = arith.constant 0 : i32
    %c0_i32_0 = arith.constant 0 : i32
    return %arg0, %c0_i32 : i32, i32
  }
}

</mosaic_0001>

<bundles_post_ra>
// kernel: tpu_custom_call.1
= control target key start
LH: loop header
LB: loop body
LE: loop exit
PB: predicated region body
PF: predicated region fallthrough
CT: control target
= control target key end

     0   :  { %8 = vsyncpa [#allocation3], 0  ;;  %s681_s0 = inlined_call_operand.hbm [shape: f32[16,128], index: 0, kind: input, shape index: {}]   ;;  %s682_s1 = inlined_call_operand.hbm [shape: f32[16,128], index: 1, kind: output, shape index: {0}]   ;;  %s683_s2 = inlined_call_operand.hbm [shape: f32[16,128], index: 2, kind: output, shape index: {1}]  }
   0x1   :  { %10 = vsyncpa [#allocation3 + $0x1], 0 }
   0x2   :  { %11 = vsyncpa [#allocation4], 0 }
   0x3   :  { %13 = vsyncpa [#allocation4 + $0x1], 0 }
   0x4   :  { %14 = vsyncpa [#allocation7], 0 }
   0x5   :  { %16 = vsyncpa [#allocation7 + $0x1], 0  ;;  %s528_s9 = smov 0   ;;  %s530_s10 = smov 0  }
   0x6   :  { %s532_s11 = smov 0   ;;  %s534_s12 = smov 0  }
   0x7 LB: > { %s549_s13 = sadd.s32 4294967295, %s511_s12   ;;  %s316_s14 = sadd.s32 4294967294, %s511_s12   ;;  %s511_s12 = sphi %s534_s12, %s693_s12   ;;  %s507_s11 = sphi %s532_s11, %s692_s11   ;;  %s503_s10 = sphi %s530_s10, %s691_s10   ;;  %s499_s9 = sphi %s528_s9, %s690_s9  }
   0x8   : > { %s553_s15 = sadd.s32 1, %s511_s12   ;;  %s29_s16 = sadd.s32 1, %s507_s11 }
   0x9   : > { %s26_s17 = ssub.s32 %s511_s12, %s553_s15  ;;  %p36_p0 = scmp.ne.s32.totalorder %s507_s11, %s503_s10 }
   0xa   : > { %p27_p1 = scmp.eq.s32.totalorder %s26_s17, 0  ;;  %p37_p2 = scmp.eq.s32.totalorder %s511_s12, 0 }
   0xb   : > { %p42_p3 = scmp.ne.s32.totalorder %s503_s10, %s499_s9  ;;  %p43_p4 = scmp.eq.s32.totalorder %s549_s13, 0 }
   0xc   : > { %s565_s18 = scalar_select %p27_p1, %s507_s11, %s29_s16  }
   0xd   : > { %p567_p5 = por %p37_p2, %p36_p0  ;;  %p571_p6 = por %p43_p4, %p42_p3 }
   0xe   : > { %p66_p7 = scmp.eq.s32.totalorder %s549_s13, 1  ;;  %p72_p8 = scmp.eq.s32.totalorder %s316_s14, 1 }
   0xf   : > { %p349_p10 = scmp.lt.s32.totalorder %s511_s12, 2  ;;  %s118_s23 = sand.u32 1, %s507_s11  }
  0x10   : > { %p578_p11 = por %p66_p7, %p36_p0  ;;  %p582_p12 = por %p72_p8, %p42_p3 }
  0x11   : > { %s320_s24 = sshll.u32 %s511_s12, 3  ;;  %s319_s25 = sshll.u32 %s118_s23, 3 }
  0x12   : > { %s126_s28 = scalar_lea.hbm %s681_s0, %s320_s24  ;;  %s122_s30 = scalar_lea.vmem [#allocation2], %s319_s25 }
  0x13   : > { %s128_s29 = sshll.u32 %s126_s28, 4  ;;  %s130_s3 = sshll.u32 %s122_s30, 4  ;;  %s129_s29 = int_to_ptr.hbm [resolvable:$true] %s128_s29  ;;  %s131_s3 = int_to_ptr.vmem [resolvable:$true] %s130_s3 }
  0x14   : > { %p593_p13 = pnand %p349_p10, %p567_p5  ;;  %p321_p0 = scmp.ge.s32.totalorder %s511_s12, 1 }
  0x15   : > { %p135_p1 = scmp.lt.s32.totalorder %s511_s12, 3  ;;  %s119_s5 = scalar_lea.sflag [#allocation3], %s118_s23 }
  0x16   : > { %s383_s6 = sshra.s32 %s129_s29, 4  ;;  %p387_p3 = pneg %p593_p13  ;;  %s384_s6 = int_to_ptr.hbm [resolvable:$true] %s383_s6 }
  0x17   : > { %s385_s7 = scalar_lea.hbm %s384_s6, 8  ;;  %s390_s16 = scalar_lea.hbm %s681_s0, 16 }
  0x18   : > { %p386_p2 = scmp.ne.s32.totalorder %s384_s6, %s385_s7  ;;  %p391_p5 = scmp.lt.s32.totalorder %s384_s6, %s681_s0 }
  0x19   : > { %p392_p8 = scmp.lt.s32.totalorder %s390_s16, %s385_s7 }
  0x1a   : > { %p388_p4 = pnand %p387_p3, %p386_p2 }
  0x1b   : > { %p393_p10 = por %p392_p8, %p391_p5 }
  0x1c   : > { %p389_p7 = pneg %p388_p4 }
  0x1e   : > { %p394_p9 = pnand %p393_p10, %p389_p7 }
  0x20   : > { %397 = shalt.err (!%p394_p9)
}
  0x21   : > { %341 = dma.hbm_to_vmem [thread:$0]  (!%p593_p13), %s129_s29, 128, %s131_s3, %s119_s5  }
  0x22   : > { %p136_p2 = pnand %p321_p0, %p135_p1 }
  0x23   : > { %s614_s23 = sand.u32 (!%p136_p2), 1, %s503_s10  }
  0x24   : > { %139 = sbr.rel (%p136_p2) target bundleno = 71 (0x47), region = 24  ;;  %s322_s24 = sshll.u32 (!%p136_p2), %s614_s23, 3 }
  0x25   : > { %s142_s25 = scalar_lea.sflag (!%p136_p2), [#allocation3], %s614_s23  ;;  %s145_s26 = scalar_lea.vmem (!%p136_p2), [#allocation2], %s322_s24 }
  0x29   : > { %486 = dma.done.wait (%p571_p6), %s142_s25, 128  }
  0x2a   : > { %488 = vsyncadd (%p571_p6), %s142_s25, 4294967168  ;;  %s328_s27 = sshll.u32 %s549_s13, 3  ;;  %s164_s6 = scalar_lea.vmem [#allocation5], %s322_s24  ;;  %v172_v0 = vld [vmem:[%s145_s26] sm:$0xff] }
  0x2b   : > { %s194_s30 = scalar_lea.hbm %s682_s1, %s328_s27  ;;  %s208_s5 = scalar_lea.hbm %s683_s2, %s328_s27  ;;  %v325_v1 = vadd.f32 -3.0, %v172_v0 }
  0x2c   : > { %s629_s7 = sshll.u32 %s164_s6, 4  ;;  %s171_s8 = scalar_lea.vmem [#allocation6], %s322_s24  ;;  %s197_s7 = int_to_ptr.vmem [resolvable:$true] %s629_s7 }
  0x2d   : > { %s631_s14 = sshll.u32 %s171_s8, 4  ;;  %s198_s20 = sshll.u32 %s194_s30, 4  ;;  %v174_v2 = vmul.f32 %v325_v1, %v172_v0  ;;  %v176_v3 = vadd.f32 %v325_v1, %v172_v0  ;;  %s211_s14 = int_to_ptr.vmem [resolvable:$true] %s631_s14  ;;  %s199_s20 = int_to_ptr.hbm [resolvable:$true] %s198_s20 }
  0x2e   : > { %s212_s13 = sshll.u32 %s208_s5, 4  ;;  %s179_s16 = scalar_lea.sflag [#allocation4], %s614_s23  ;;  %s635_s13 = int_to_ptr.hbm [resolvable:$true] %s212_s13 }
  0x2f   : > { %175 = vst [vmem:[%s164_s6] sm:$0xff] %v174_v2  ;;  %s427_s17 = sshra.s32 %s199_s20, 4  ;;  %s433_s26 = scalar_lea.hbm %s682_s1, 16  ;;  %s428_s17 = int_to_ptr.hbm [resolvable:$true] %s427_s17 }
  0x30   : > { %177 = vst [vmem:[%s171_s8] sm:$0xff] %v176_v3  ;;  %s429_s19 = scalar_lea.hbm %s428_s17, 8  ;;  %p434_p0 = scmp.lt.s32.totalorder %s428_s17, %s682_s1 }
  0x31   : > { %p430_p6 = scmp.ne.s32.totalorder %s428_s17, %s429_s19  ;;  %p435_p1 = scmp.lt.s32.totalorder %s433_s26, %s429_s19 }
  0x33   : > { %p431_p9 = pnand %p430_p6, %p578_p11  ;;  %p436_p3 = por %p435_p1, %p434_p0 }
  0x35   : > { %p432_p13 = pneg %p431_p9 }
  0x37   : > { %p437_p4 = pnand %p436_p3, %p432_p13 }
  0x39   : > { %440 = shalt.err (!%p437_p4)
}
  0x3a   : > { %334 = dma.vmem_to_hbm [thread:$0]  (%p578_p11), %s197_s7, 128, %s199_s20, %s179_s16  }
  0x3b   : > { %s184_s29 = scalar_lea.sflag [#allocation7], %s614_s23  ;;  %s455_s30 = sshra.s32 %s635_s13, 4  ;;  %s456_s30 = int_to_ptr.hbm [resolvable:$true] %s455_s30 }
  0x3c   : > { %s457_s3 = scalar_lea.hbm %s456_s30, 8  ;;  %s461_s6 = scalar_lea.hbm %s683_s2, 16 }
  0x3d   : > { %p458_p7 = scmp.ne.s32.totalorder %s456_s30, %s457_s3  ;;  %p462_p10 = scmp.lt.s32.totalorder %s456_s30, %s683_s2 }
  0x3e   : > { %p463_p2 = scmp.lt.s32.totalorder %s461_s6, %s457_s3 }
  0x3f   : > { %p459_p5 = pnand %p458_p7, %p578_p11 }
  0x40   : > { %p464_p6 = por %p463_p2, %p462_p10 }
  0x41   : > { %p460_p8 = pneg %p459_p5 }
  0x43   : > { %p465_p9 = pnand %p464_p6, %p460_p8 }
  0x45   : > { %468 = shalt.err (!%p465_p9)
}
  0x46   : > { %335 = dma.vmem_to_hbm [thread:$0]  (%p578_p11), %s211_s14, 128, %s635_s13, %s184_s29  }
  0x47 PF: > { %s224_s23 = sand.u32 1, %s499_s9   ;;  %p689_p13 = scmp.ge.s32.totalorder %s511_s12, 2 }
  0x48   : > { %s225_s7 = scalar_lea.sflag [#allocation4], %s224_s23 }
  0x49   : > { %p343_p0 = pnand %p689_p13, %p582_p12 }
  0x4b   : > { %p344_p1 = pneg %p343_p0 }
  0x4d   : > { %490 = dma.done.wait (%p344_p1), %s225_s7, 128  }
  0x4e   : > { %492 = vsyncadd (%p344_p1), %s225_s7, 4294967168  ;;  %s235_s20 = scalar_lea.sflag [#allocation7], %s224_s23 }
  0x4f   : > { %494 = dma.done.wait (%p344_p1), %s235_s20, 128  }
  0x50   : > { %496 = vsyncadd (%p344_p1), %s235_s20, 4294967168  ;;  %p19_p11 = scmp.ge.s32.totalorder %s553_s15, 4   ;;  %s690_s9 = smov %s503_s10 }
  0x51   : > { %s691_s10 = smov %s507_s11  ;;  %s692_s11 = smov %s565_s18 }
  0x52   : > { %s693_s12 = smov %s553_s15  ;;  %21 = sbr.rel (!%p19_p11) target bundleno = 7 (0x7), region = 86 }
  0x57   :  { %241 = vsyncpa [#allocation3], 1 }
  0x58   :  { %243 = vsyncpa [#allocation3 + $0x1], 1 }
  0x59   :  { %244 = vsyncpa [#allocation4], 1 }
  0x5a   :  { %246 = vsyncpa [#allocation4 + $0x1], 1 }
  0x5b   :  { %247 = vsyncpa [#allocation7], 1 }
  0x5c   :  { %249 = vsyncpa [#allocation7 + $0x1], 1 }

</bundles_post_ra>
